<compile_context>
chip_gen: v6e
topology: v6e:2x2x1
jax: 0.10.0
libtpu: 0.0.40
codegen_flags: <defaults>
</compile_context>

<pallas_src>
import functools

import jax
import jax.numpy as jnp
from jax.experimental import pallas as pl
from jax.experimental.pallas import tpu as pltpu

LN_EPS = 1e-5
_TILE = 1024          # tm = tk tile for the (N, N) adjacency


def _round_up(x, m):
    return (x + m - 1) // m * m


# ---------------------------------------------------------------------------
# Shared in-kernel helpers.
# ---------------------------------------------------------------------------
def _scaled_features(nhid, h, w, norm_src_col):
    """bf16 (H @ W) with rows scaled by D_src^{-1/2}; column `nhid` is an
    all-ones probe lane so the aggregation matmul also accumulates in-degree."""
    hw = jnp.dot(h, w, preferred_element_type=jnp.float32)        # (tk, hp) f32
    hw = hw * norm_src_col                                        # per-src row scale
    lane = jax.lax.broadcasted_iota(jnp.int32, hw.shape, 1)
    hw = jnp.where(lane == nhid, 1.0, hw)                         # in-degree probe
    return hw.astype(jnp.bfloat16)


def _ln_epilogue(nhid, acc, norm_dst, b, g, be):
    """y = D_dst^{-1/2} acc + b on the real nhid lanes, then LayerNorm."""
    lane = jax.lax.broadcasted_iota(jnp.int32, acc.shape, 1)
    mask = lane < nhid
    y = jnp.where(mask, acc * norm_dst + b, 0.0)                  # padded lanes = 0
    inv_h = 1.0 / float(nhid)
    mean = jnp.sum(y, axis=-1, keepdims=True) * inv_h
    centered = jnp.where(mask, y - mean, 0.0)
    var = jnp.sum(centered * centered, axis=-1, keepdims=True) * inv_h
    y_n = centered * jax.lax.rsqrt(var + LN_EPS)
    return jnp.where(mask, y_n * g + be, 0.0)


# ---------------------------------------------------------------------------
# Fully-fused single-tile kernel (whole padded graph fits one (np, np) tile).
# ---------------------------------------------------------------------------
def _gcn_fused_kernel(nhid, a_ref, h_ref, w_ref, b_ref, g_ref, be_ref, o_ref):
    a = a_ref[...]                                                # (np, np) bf16
    npad = a.shape[0]
    ones_row = jnp.ones((1, npad), dtype=a.dtype)
    ones_col = jnp.ones((npad, 1), dtype=a.dtype)
    # Degrees on the MXU (exact integer counts accumulated in f32).
    out_deg = jnp.dot(ones_row, a, preferred_element_type=jnp.float32)  # (1, np)
    in_deg = jnp.dot(a, ones_col, preferred_element_type=jnp.float32)   # (np, 1)
    norm_src = jax.lax.rsqrt(jnp.maximum(out_deg, 1.0)).astype(jnp.bfloat16)
    norm_dst = jax.lax.rsqrt(jnp.maximum(in_deg, 1.0))
    # Fold D_src^{-1/2} into A's columns (row broadcast, stays bf16).
    a_n = a * norm_src
    hw = jnp.dot(h_ref[...], w_ref[...],
                 preferred_element_type=jnp.float32).astype(jnp.bfloat16)
    acc = jnp.dot(a_n, hw, preferred_element_type=jnp.float32)    # bf16 MXU, f32 acc
    o_ref[...] = _ln_epilogue(nhid, acc, norm_dst, b_ref[...], g_ref[...],
                              be_ref[...]).astype(o_ref.dtype)


# ---------------------------------------------------------------------------
# General path, pass 1: out_deg[src] = sum_dst A[dst, src]
# (tiled reduction over dst tiles; column sums via a ones-row MXU matmul).
# ---------------------------------------------------------------------------
def _out_degree_kernel(a_ref, od_ref):
    i = pl.program_id(1)                                          # dst-tile (reduction)

    @pl.when(i == 0)
    def _():
        od_ref[...] = jnp.zeros_like(od_ref)

    ones_row = jnp.ones((1, a_ref.shape[0]), dtype=a_ref.dtype)   # bf16
    od_ref[...] += jnp.dot(ones_row, a_ref[...],
                           preferred_element_type=jnp.float32)


# ---------------------------------------------------------------------------
# General path, pass 2: for each (dst tile i, src tile k)
#   hw_k = D_src^{-1/2} (H_k @ W) in bf16 (recomputed, W resident in VMEM),
#   o[i] += A[i, k] @ hw_k   (bf16 MXU, f32 resident output block),
#   epilogue at the last k: in_deg from the probe lane, bias + LayerNorm.
# ---------------------------------------------------------------------------
def _aggregate_kernel(nhid, a_ref, h_ref, w_ref, ns_ref, b_ref, g_ref, be_ref,
                      o_ref):
    k = pl.program_id(1)

    @pl.when(k == 0)
    def _():
        o_ref[...] = jnp.zeros_like(o_ref)

    hw = _scaled_features(nhid, h_ref[...], w_ref[...], ns_ref[...])
    o_ref[...] += jnp.dot(a_ref[...], hw, preferred_element_type=jnp.float32)

    @pl.when(k == pl.num_programs(1) - 1)
    def _():
        acc = o_ref[...]                                          # (tm, hp) f32
        lane = jax.lax.broadcasted_iota(jnp.int32, acc.shape, 1)
        in_deg = jnp.sum(jnp.where(lane == nhid, acc, 0.0), axis=-1,
                         keepdims=True)
        norm_dst = jax.lax.rsqrt(jnp.maximum(in_deg, 1.0))
        o_ref[...] = _ln_epilogue(nhid, acc, norm_dst, b_ref[...], g_ref[...],
                                  be_ref[...]).astype(o_ref.dtype)


def gcn_layer_forward(adj, h, weight, bias, gamma, beta, *, tile=_TILE):
    """adj: (N, N) dense 0/1 adjacency (adj[dst, src] = 1 if edge src->dst),
       ideally already bf16.  h: (N, nfeat), weight: (nfeat, nhid).
       Returns (N, nhid) float32."""
    n, nfeat = h.shape
    nhid = weight.shape[1]

    # Tile / padding geometry.
    n_pad128 = _round_up(n, 128)
    tm = tk = min(tile, n_pad128)
    n_pad = _round_up(n_pad128, tm)
    hp = _round_up(nhid + 1, 128)            # >= nhid+1: spare lane for in-degree
    n_i = n_pad // tm
    n_k = n_pad // tk

    # A streamed as bf16 (0/1 exact). Cast/pad only if the caller did not
    # already store it packed/padded (zero-padding is semantically neutral).
    adj_b = adj if adj.dtype == jnp.bfloat16 else adj.astype(jnp.bfloat16)
    if adj_b.shape != (n_pad, n_pad):
        adj_b = jnp.pad(adj_b, ((0, n_pad - n), (0, n_pad - n)))

    h_p = jnp.pad(h.astype(jnp.float32), ((0, n_pad - n), (0, 0)))
    w_p = jnp.pad(weight.astype(jnp.float32), ((0, 0), (0, hp - nhid)))
    b_p = jnp.pad(jnp.reshape(bias, (1, nhid)).astype(jnp.float32),
                  ((0, 0), (0, hp - nhid)))
    g_p = jnp.pad(jnp.reshape(gamma, (1, nhid)).astype(jnp.float32),
                  ((0, 0), (0, hp - nhid)))
    be_p = jnp.pad(jnp.reshape(beta, (1, nhid)).astype(jnp.float32),
                   ((0, 0), (0, hp - nhid)))

    if n_i == 1:
        # Whole padded graph is one tile: single fused launch (degrees + H@W +
        # aggregation + LayerNorm).
        out_p = pl.pallas_call(
            functools.partial(_gcn_fused_kernel, nhid),
            out_shape=jax.ShapeDtypeStruct((n_pad, hp), jnp.float32),
            grid=(1,),
            in_specs=[
                pl.BlockSpec((n_pad, n_pad), lambda i: (0, 0)),   # A (bf16)
                pl.BlockSpec((n_pad, nfeat), lambda i: (0, 0)),   # H
                pl.BlockSpec((nfeat, hp), lambda i: (0, 0)),      # W
                pl.BlockSpec((1, hp), lambda i: (0, 0)),          # bias
                pl.BlockSpec((1, hp), lambda i: (0, 0)),          # gamma
                pl.BlockSpec((1, hp), lambda i: (0, 0)),          # beta
            ],
            out_specs=pl.BlockSpec((n_pad, hp), lambda i: (0, 0)),
        )(adj_b, h_p, w_p, b_p, g_p, be_p)
        return out_p[:n, :nhid]

    # ---- General tiled path --------------------------------------------
    # Pass 1: out-degrees (per src column), reduction over dst tiles.
    out_deg = pl.pallas_call(
        _out_degree_kernel,
        out_shape=jax.ShapeDtypeStruct((1, n_pad), jnp.float32),
        grid=(n_k, n_i),
        in_specs=[pl.BlockSpec((tm, tk), lambda k, i: (i, k))],
        out_specs=pl.BlockSpec((1, tk), lambda k, i: (0, k)),
        compiler_params=pltpu.CompilerParams(
            dimension_semantics=("parallel", "arbitrary")),
    )(adj_b)

    # Tiny XLA ops (n_pad elements): clamp/rsqrt and relayout to a column so the
    # kernel can row-scale hw without a transpose.
    norm_src_col = jnp.reshape(jax.lax.rsqrt(jnp.maximum(out_deg, 1.0)),
                               (n_pad, 1))

    # Pass 2: fused feature transform + aggregation + bias + LayerNorm.
    # VMEM/budget: A 2 buf * tm*tk*2 B (4 MiB at 1024) + resident o block + small
    # operands ~= 6 MiB at hp=128 -> fits scoped defaults on v5e/v6e/v7x.
    out_p = pl.pallas_call(
        functools.partial(_aggregate_kernel, nhid),
        out_shape=jax.ShapeDtypeStruct((n_pad, hp), jnp.float32),
        grid=(n_i, n_k),
        in_specs=[
            pl.BlockSpec((tm, tk), lambda i, k: (i, k)),          # A (bf16)
            pl.BlockSpec((tk, nfeat), lambda i, k: (k, 0)),       # H src tile
            pl.BlockSpec((nfeat, hp), lambda i, k: (0, 0)),       # W (resident)
            pl.BlockSpec((tk, 1), lambda i, k: (k, 0)),           # D_src^-1/2 col
            pl.BlockSpec((1, hp), lambda i, k: (0, 0)),           # bias
            pl.BlockSpec((1, hp), lambda i, k: (0, 0)),           # gamma
            pl.BlockSpec((1, hp), lambda i, k: (0, 0)),           # beta
        ],
        out_specs=pl.BlockSpec((tm, hp), lambda i, k: (i, 0)),
        compiler_params=pltpu.CompilerParams(
            dimension_semantics=("parallel", "arbitrary")),
    )(adj_b, h_p, w_p, norm_src_col, b_p, g_p, be_p)

    return out_p[:n, :nhid]


def reference_forward(adj, h, weight, bias, gamma, beta):
    out_deg = jnp.maximum(jnp.sum(adj, axis=0, keepdims=True), 1.0)
    in_deg = jnp.maximum(jnp.sum(adj, axis=1, keepdims=True), 1.0)
    a_hat = adj * (out_deg ** -0.5) * (in_deg ** -0.5)
    y = a_hat @ (h @ weight) + bias
    mean = jnp.mean(y, axis=-1, keepdims=True)
    var = jnp.mean((y - mean) ** 2, axis=-1, keepdims=True)
    return (y - mean) * jax.lax.rsqrt(var + LN_EPS) * gamma + beta


def _make_case(key, n, nfeat, nhid):
    k_adj, k_h, k_w = jax.random.split(key, 3)
    adj = (jax.random.uniform(k_adj, (n, n)) > 0.7).astype(jnp.float32)
    adj = jnp.maximum(adj, jnp.eye(n, dtype=jnp.float32))          # self-loops
    h = jax.random.normal(k_h, (n, nfeat), dtype=jnp.float32)
    limit = (6.0 / (nfeat + nhid)) ** 0.5
    weight = jax.random.uniform(k_w, (nfeat, nhid), minval=-limit, maxval=limit,
                                dtype=jnp.float32)
    bias = jnp.zeros((1, nhid), dtype=jnp.float32)
    gamma = jnp.ones((1, nhid), dtype=jnp.float32)
    beta = jnp.zeros((1, nhid), dtype=jnp.float32)
    return adj, h, weight, bias, gamma, beta


if __name__ == "__main__":
    key = jax.random.PRNGKey(0)
    k1, k2 = jax.random.split(key)

    # Case 1: shipped tiny shape -> fully fused single-tile kernel.
    N, NFEAT, NHID = 16, 8, 32
    adj_f32, h, weight, bias, gamma, beta = _make_case(k1, N, NFEAT, NHID)
    adj_bf16 = adj_f32.astype(jnp.bfloat16)        # pre-packed A (0/1 exact)
    out = jax.block_until_ready(
        gcn_layer_forward(adj_bf16, h, weight, bias, gamma, beta))
    ref = reference_forward(adj_f32, h, weight, bias, gamma, beta)
    assert out.shape == (N, NHID)
    assert jnp.allclose(out, ref, atol=3e-2, rtol=3e-2), \
        float(jnp.max(jnp.abs(out - ref)))

    # Case 2: multi-tile general path (padding + tiled out-degree + aggregation),
    # exercised with a small tile so it stays cheap.
    N2, NFEAT2, NHID2 = 200, 8, 32
    adj2_f32, h2, w2, b2, g2, be2 = _make_case(k2, N2, NFEAT2, NHID2)
    out2 = jax.block_until_ready(
        gcn_layer_forward(adj2_f32.astype(jnp.bfloat16), h2, w2, b2, g2, be2,
                          tile=128))
    ref2 = reference_forward(adj2_f32, h2, w2, b2, g2, be2)
    assert out2.shape == (N2, NHID2)
    assert jnp.allclose(out2, ref2, atol=3e-2, rtol=3e-2), \
        float(jnp.max(jnp.abs(out2 - ref2)))

    print("KERNEL_OK")
</pallas_src>

<mosaic_0001>
module attributes {stable_mosaic.version = 11 : i64} {
  func.func @_gcn_fused_kernel(%arg0: i32, %arg1: memref<128x128xbf16, #tpu.memory_space<vmem>>, %arg2: memref<128x8xf32, #tpu.memory_space<vmem>>, %arg3: memref<8x128xf32, #tpu.memory_space<vmem>>, %arg4: memref<1x128xf32, #tpu.memory_space<vmem>>, %arg5: memref<1x128xf32, #tpu.memory_space<vmem>>, %arg6: memref<1x128xf32, #tpu.memory_space<vmem>>, %arg7: memref<128x128xf32, #tpu.memory_space<vmem>>) attributes {dimension_semantics = [#tpu.dimension_semantics<arbitrary>], iteration_bounds = array<i64: 1>, scalar_prefetch = 0 : i64, scratch_operands = 0 : i64, tpu.core_type = #tpu.core_type<tc>, window_params = [{pipeline_mode = #tpu.pipeline_mode<synchronous>, transform_indices = @transform_0, window_bounds = array<i64: 128, 128>}, {pipeline_mode = #tpu.pipeline_mode<synchronous>, transform_indices = @transform_1, window_bounds = array<i64: 128, 8>}, {pipeline_mode = #tpu.pipeline_mode<synchronous>, transform_indices = @transform_2, window_bounds = array<i64: 8, 128>}, {pipeline_mode = #tpu.pipeline_mode<synchronous>, transform_indices = @transform_3, window_bounds = array<i64: 1, 128>}, {pipeline_mode = #tpu.pipeline_mode<synchronous>, transform_indices = @transform_4, window_bounds = array<i64: 1, 128>}, {pipeline_mode = #tpu.pipeline_mode<synchronous>, transform_indices = @transform_5, window_bounds = array<i64: 1, 128>}, {pipeline_mode = #tpu.pipeline_mode<synchronous>, transform_indices = @transform_6, window_bounds = array<i64: 128, 128>}]} {
    %c0 = arith.constant 0 : index
    %c0_0 = arith.constant 0 : index
    %0 = vector.load %arg1[%c0, %c0_0] : memref<128x128xbf16, #tpu.memory_space<vmem>>, vector<128x128xbf16>
    %cst = arith.constant 1.000000e+00 : bf16
    %1 = vector.broadcast %cst : bf16 to vector<1x128xbf16>
    %cst_1 = arith.constant 1.000000e+00 : bf16
    %2 = vector.broadcast %cst_1 : bf16 to vector<128x1xbf16>
    %cst_2 = arith.constant dense<0.000000e+00> : vector<1x128xf32>
    %3 = tpu.matmul %1, %0, %cst_2 {dimension_numbers = #tpu.dot_dimension_numbers<[1], [0], [0], [1], [0, 0, 1, 1], [], []>} : vector<1x128xbf16>, vector<128x128xbf16>, vector<1x128xf32> -> vector<1x128xf32>
    %cst_3 = arith.constant dense<0.000000e+00> : vector<128x1xf32>
    %4 = tpu.matmul %0, %2, %cst_3 {dimension_numbers = #tpu.dot_dimension_numbers<[1], [0], [0], [1], [0, 0, 1, 1], [], []>} : vector<128x128xbf16>, vector<128x1xbf16>, vector<128x1xf32> -> vector<128x1xf32>
    %cst_4 = arith.constant 1.000000e+00 : f32
    %5 = vector.broadcast %cst_4 : f32 to vector<1x128xf32>
    %6 = arith.maximumf %3, %5 : vector<1x128xf32>
    %7 = math.rsqrt %6 : vector<1x128xf32>
    %8 = arith.truncf %7 : vector<1x128xf32> to vector<1x128xbf16>
    %cst_5 = arith.constant 1.000000e+00 : f32
    %9 = vector.broadcast %cst_5 : f32 to vector<128x1xf32>
    %10 = arith.maximumf %4, %9 : vector<128x1xf32>
    %11 = math.rsqrt %10 : vector<128x1xf32>
    %12 = vector.broadcast %8 : vector<1x128xbf16> to vector<128x128xbf16>
    %13 = arith.mulf %0, %12 : vector<128x128xbf16>
    %c0_6 = arith.constant 0 : index
    %c0_7 = arith.constant 0 : index
    %14 = vector.load %arg2[%c0_6, %c0_7] : memref<128x8xf32, #tpu.memory_space<vmem>>, vector<128x8xf32>
    %c0_8 = arith.constant 0 : index
    %c0_9 = arith.constant 0 : index
    %15 = vector.load %arg3[%c0_8, %c0_9] : memref<8x128xf32, #tpu.memory_space<vmem>>, vector<8x128xf32>
    %cst_10 = arith.constant dense<0.000000e+00> : vector<128x128xf32>
    %16 = tpu.matmul %14, %15, %cst_10 {dimension_numbers = #tpu.dot_dimension_numbers<[1], [0], [0], [1], [0, 0, 1, 1], [], []>} : vector<128x8xf32>, vector<8x128xf32>, vector<128x128xf32> -> vector<128x128xf32>
    %17 = arith.truncf %16 : vector<128x128xf32> to vector<128x128xbf16>
    %cst_11 = arith.constant dense<0.000000e+00> : vector<128x128xf32>
    %18 = tpu.matmul %13, %17, %cst_11 {dimension_numbers = #tpu.dot_dimension_numbers<[1], [0], [0], [1], [0, 0, 1, 1], [], []>} : vector<128x128xbf16>, vector<128x128xbf16>, vector<128x128xf32> -> vector<128x128xf32>
    %c0_12 = arith.constant 0 : index
    %c0_13 = arith.constant 0 : index
    %19 = vector.load %arg4[%c0_12, %c0_13] : memref<1x128xf32, #tpu.memory_space<vmem>>, vector<1x128xf32>
    %c0_14 = arith.constant 0 : index
    %c0_15 = arith.constant 0 : index
    %20 = vector.load %arg5[%c0_14, %c0_15] : memref<1x128xf32, #tpu.memory_space<vmem>>, vector<1x128xf32>
    %c0_16 = arith.constant 0 : index
    %c0_17 = arith.constant 0 : index
    %21 = vector.load %arg6[%c0_16, %c0_17] : memref<1x128xf32, #tpu.memory_space<vmem>>, vector<1x128xf32>
    %22 = tpu.iota {dimensions = array<i32: 1>} : vector<128x128xi32>
    %c32_i32 = arith.constant 32 : i32
    %23 = vector.broadcast %c32_i32 : i32 to vector<128x128xi32>
    %24 = arith.cmpi slt, %22, %23 : vector<128x128xi32>
    %25 = vector.broadcast %11 : vector<128x1xf32> to vector<128x128xf32>
    %26 = arith.mulf %18, %25 : vector<128x128xf32>
    %27 = vector.broadcast %19 : vector<1x128xf32> to vector<128x128xf32>
    %28 = arith.addf %26, %27 : vector<128x128xf32>
    %cst_18 = arith.constant 0.000000e+00 : f32
    %29 = vector.broadcast %cst_18 : f32 to vector<128x128xf32>
    %30 = arith.select %24, %28, %29 : vector<128x128xi1>, vector<128x128xf32>
    %cst_19 = arith.constant dense<0.000000e+00> : vector<128xf32>
    %31 = vector.multi_reduction <add>, %30, %cst_19 [1] : vector<128x128xf32> to vector<128xf32>
    %32 = vector.shape_cast %31 : vector<128xf32> to vector<128x1xf32>
    %cst_20 = arith.constant 3.125000e-02 : f32
    %33 = vector.broadcast %cst_20 : f32 to vector<128x1xf32>
    %34 = arith.mulf %32, %33 : vector<128x1xf32>
    %35 = vector.broadcast %34 : vector<128x1xf32> to vector<128x128xf32>
    %36 = arith.subf %30, %35 : vector<128x128xf32>
    %cst_21 = arith.constant 0.000000e+00 : f32
    %37 = vector.broadcast %cst_21 : f32 to vector<128x128xf32>
    %38 = arith.select %24, %36, %37 : vector<128x128xi1>, vector<128x128xf32>
    %39 = arith.mulf %38, %38 : vector<128x128xf32>
    %cst_22 = arith.constant dense<0.000000e+00> : vector<128xf32>
    %40 = vector.multi_reduction <add>, %39, %cst_22 [1] : vector<128x128xf32> to vector<128xf32>
    %41 = vector.shape_cast %40 : vector<128xf32> to vector<128x1xf32>
    %cst_23 = arith.constant 3.125000e-02 : f32
    %42 = vector.broadcast %cst_23 : f32 to vector<128x1xf32>
    %43 = arith.mulf %41, %42 : vector<128x1xf32>
    %cst_24 = arith.constant 9.99999974E-6 : f32
    %44 = vector.broadcast %cst_24 : f32 to vector<128x1xf32>
    %45 = arith.addf %43, %44 : vector<128x1xf32>
    %46 = math.rsqrt %45 : vector<128x1xf32>
    %47 = vector.broadcast %46 : vector<128x1xf32> to vector<128x128xf32>
    %48 = arith.mulf %38, %47 : vector<128x128xf32>
    %49 = vector.broadcast %20 : vector<1x128xf32> to vector<128x128xf32>
    %50 = arith.mulf %48, %49 : vector<128x128xf32>
    %51 = vector.broadcast %21 : vector<1x128xf32> to vector<128x128xf32>
    %52 = arith.addf %50, %51 : vector<128x128xf32>
    %cst_25 = arith.constant 0.000000e+00 : f32
    %53 = vector.broadcast %cst_25 : f32 to vector<128x128xf32>
    %54 = arith.select %24, %52, %53 : vector<128x128xi1>, vector<128x128xf32>
    %c0_26 = arith.constant 0 : index
    %c0_27 = arith.constant 0 : index
    %55 = vector.load %arg7[%c0_26, %c0_27] : memref<128x128xf32, #tpu.memory_space<vmem>>, vector<128x128xf32>
    tpu.vector_store %arg7[%c0_26, %c0_27], %54 {strides = array<i32>} : memref<128x128xf32, #tpu.memory_space<vmem>>, vector<128x128xf32>,
    return
  }
  func.func @transform_0(%arg0: i32) -> (i32, i32) {
    %c0_i32 = arith.constant 0 : i32
    %c0_i32_0 = arith.constant 0 : i32
    %c0_i32_1 = arith.constant 0 : i32
    return %c0_i32, %c0_i32_0 : i32, i32
  }
  func.func @transform_1(%arg0: i32) -> (i32, i32) {
    %c0_i32 = arith.constant 0 : i32
    %c0_i32_0 = arith.constant 0 : i32
    %c0_i32_1 = arith.constant 0 : i32
    return %c0_i32, %c0_i32_0 : i32, i32
  }
  func.func @transform_2(%arg0: i32) -> (i32, i32) {
    %c0_i32 = arith.constant 0 : i32
    %c0_i32_0 = arith.constant 0 : i32
    %c0_i32_1 = arith.constant 0 : i32
    return %c0_i32, %c0_i32_0 : i32, i32
  }
  func.func @transform_3(%arg0: i32) -> (i32, i32) {
    %c0_i32 = arith.constant 0 : i32
    %c0_i32_0 = arith.constant 0 : i32
    %c0_i32_1 = arith.constant 0 : i32
    return %c0_i32, %c0_i32_0 : i32, i32
  }
  func.func @transform_4(%arg0: i32) -> (i32, i32) {
    %c0_i32 = arith.constant 0 : i32
    %c0_i32_0 = arith.constant 0 : i32
    %c0_i32_1 = arith.constant 0 : i32
    return %c0_i32, %c0_i32_0 : i32, i32
  }
  func.func @transform_5(%arg0: i32) -> (i32, i32) {
    %c0_i32 = arith.constant 0 : i32
    %c0_i32_0 = arith.constant 0 : i32
    %c0_i32_1 = arith.constant 0 : i32
    return %c0_i32, %c0_i32_0 : i32, i32
  }
  func.func @transform_6(%arg0: i32) -> (i32, i32) {
    %c0_i32 = arith.constant 0 : i32
    %c0_i32_0 = arith.constant 0 : i32
    %c0_i32_1 = arith.constant 0 : i32
    return %c0_i32, %c0_i32_0 : i32, i32
  }
}

</mosaic_0001>

<bundles_post_ra>
// kernel: tpu_custom_call.1
= control target key start
LH: loop header
LB: loop body
LE: loop exit
PB: predicated region body
PF: predicated region fallthrough
CT: control target
= control target key end

     0   :  { %v1402_v2 = vmov 0.0   ;;  %vm1403_vm0 = vmmov 0   ;;  %v1404_v11 = vmov 1065369472   ;;  %s1994_s0 = inlined_call_operand.vmem [shape: bf16[128,128], index: 0, kind: input, shape index: {}]   ;;  %s1995_s1 = inlined_call_operand.vmem [shape: f32[128,8], index: 1, kind: input, shape index: {}]   ;;  %s1996_s2 = inlined_call_operand.vmem [shape: f32[8,128], index: 2, kind: input, shape index: {}]   ;;  %s1997_s3 = inlined_call_operand.vmem [shape: f32[1,128], index: 3, kind: input, shape index: {}]   ;;  %s1998_s4 = inlined_call_operand.vmem [shape: f32[1,128], index: 4, kind: input, shape index: {}]   ;;  %s1999_s5 = inlined_call_operand.vmem [shape: f32[1,128], index: 5, kind: input, shape index: {}]   ;;  %s2000_s6 = inlined_call_operand.hbm [shape: f32[128,128], index: 6, kind: output, shape index: {}]  }
   0x1   :  { %v1447_v0 = vld [vmem:[%s1994_s0 + $0x38] sm:$0xf]  ;;  %v1452_v1 = vld [vmem:[%s1994_s0 + $0x3c] sm:$0xf]  ;;  %1171 = vmatprep.subr.bf16.mxu0 %v1402_v2  ;;  %v1461_v4 = vld [vmem:[%s1994_s0 + $0x30] sm:$0xf]  ;;  %1187 = vmatprep.mubr.msk.bf16.mxu0 %vm1403_vm0, %v1402_v2 }
   0x2   :  { %v1456_v3 = vcombine.low %v1447_v0, %v1452_v1  ;;  %v1466_v5 = vld [vmem:[%s1994_s0 + $0x34] sm:$0xf]  ;;  %v1476_v7 = vld [vmem:[%s1994_s0 + $0x28] sm:$0xf]  ;;  %v1481_v8 = vld [vmem:[%s1994_s0 + $0x2c] sm:$0xf]  ;;  %1191 = vmatprep.subr.bf16.mxu1 %v1404_v11 }
   0x3   :  { %v1471_v6 = vcombine.low %v1461_v4, %v1466_v5  ;;  %v1486_v9 = vld [vmem:[%s1994_s0] sm:$0xf]  ;;  %v1491_v10 = vld [vmem:[%s1994_s0 + $0x4] sm:$0xf]  ;;  %v1496_v12 = vcombine.low %v1476_v7, %v1481_v8  ;;  %1192 = vmatpush3.bf16.msra.mxu1 %v1404_v11 }
   0x4   :  { %1172 = vmatpush3.bf16.msra.mxu0 %v1456_v3  ;;  %v1077_v13 = vcombine.low %v1486_v9, %v1491_v10  ;;  %v1503_v14 = vld [vmem:[%s1994_s0 + $0x20] sm:$0xf]  ;;  %v1508_v15 = vld [vmem:[%s1994_s0 + $0x24] sm:$0xf]  ;;  %1193 = vmatprep.subr.bf16.mxu1 %v1404_v11 }
   0x5   :  { %1173 = vmatprep.subr.bf16.mxu0 %v1402_v2  ;;  %v1081_v16 = vcombine.low %v1503_v14, %v1508_v15 }
   0x6   :  { %1207 = vmatprep.mubr.bf16.mxu1 %v1077_v13 }
   0x7   :  { %1194 = vmatpush3.bf16.msra.mxu1 %v1404_v11 }
   0x8   :  { %1174 = vmatpush3.bf16.msra.mxu0 %v1471_v6 }
   0x9   :  { %1175 = vmatprep.subr.bf16.mxu0 %v1402_v2 }
   0xc   :  { %1176 = vmatpush3.bf16.msra.mxu0 %v1496_v12 }
   0xd   :  { %11 = vsyncpa [#allocation3], 0  ;;  %1177 = vmatprep.subr.bf16.mxu0 %v1402_v2  ;;  %v1516_v17 = vld [vmem:[%s1994_s0 + $0x18] sm:$0xf]  ;;  %v1521_v18 = vld [vmem:[%s1994_s0 + $0x1c] sm:$0xf]  ;;  %1195 = vmatprep.subr.bf16.mxu1 %v1404_v11  ;;  %v265_v54 = vlaneseq }
   0xe   :  { %v1080_v19 = vcombine.low %v1516_v17, %v1521_v18  ;;  %1196 = vmatpush3.bf16.msra.mxu1 %v1404_v11  ;;  %v1528_v20 = vld [vmem:[%s1994_s0 + $0x10] sm:$0xf]  ;;  %v1533_v21 = vld [vmem:[%s1994_s0 + $0x14] sm:$0xf]  ;;  %v1540_v23 = vld [vmem:[%s1994_s0 + $0x8] sm:$0xf] }
   0xf   :  { %1197 = vmatprep.subr.bf16.mxu1 %v1404_v11  ;;  %v1079_v22 = vcombine.low %v1528_v20, %v1533_v21  ;;  %v1545_v24 = vld [vmem:[%s1994_s0 + $0xc] sm:$0xf]  ;;  %v305_v26 = vld [vmem:[%s1996_s2] sm:$0xff]  ;;  %vm306_vm1 = vcmask 64512   ;;  %v291_v29 = vld [vmem:[%s1995_s1 + $0x10] sm:$0xff]  ;;  %v1405_v43 = vmov 0  }
  0x10   :  { %1178 = vmatpush3.bf16.msra.mxu0 %v1081_v16  ;;  %v1078_v25 = vcombine.low %v1540_v23, %v1545_v24  ;;  %v289_v27 = vld [vmem:[%s1995_s1] sm:$0xff]  ;;  %v290_v28 = vld [vmem:[%s1995_s1 + $0x8] sm:$0xff]  ;;  %v292_v30 = vld [vmem:[%s1995_s1 + $0x18] sm:$0xff]  ;;  %1305 = vset.pattern.permute.xlu0 %v1405_v43  ;;  %v266_v61 = vshrl.u32 %v265_v54, 7 }
  0x11   :  { %1179 = vmatprep.subr.bf16.mxu0 %v1402_v2  ;;  %v293_v31 = vld [vmem:[%s1995_s1 + $0x20] sm:$0xff]  ;;  %v294_v32 = vld [vmem:[%s1995_s1 + $0x28] sm:$0xff]  ;;  %v295_v33 = vld [vmem:[%s1995_s1 + $0x30] sm:$0xff]  ;;  %1304 = vset.pattern.permute.xlu1 %v1405_v43 }
  0x12   :  { %1198 = vmatpush3.bf16.msra.mxu1 %v1404_v11  ;;  %v296_v34 = vld [vmem:[%s1995_s1 + $0x38] sm:$0xff]  ;;  %v297_v35 = vld [vmem:[%s1995_s1 + $0x40] sm:$0xff]  ;;  %v298_v36 = vld [vmem:[%s1995_s1 + $0x48] sm:$0xff] }
  0x13   :  { %1199 = vmatprep.subr.bf16.mxu1 %v1404_v11  ;;  %v299_v37 = vld [vmem:[%s1995_s1 + $0x50] sm:$0xff]  ;;  %v300_v38 = vld [vmem:[%s1995_s1 + $0x58] sm:$0xff]  ;;  %v301_v39 = vld [vmem:[%s1995_s1 + $0x60] sm:$0xff] }
  0x14   :  { %1180 = vmatpush3.bf16.msra.mxu0 %v1080_v19  ;;  %v302_v40 = vld [vmem:[%s1995_s1 + $0x68] sm:$0xff]  ;;  %v303_v41 = vld [vmem:[%s1995_s1 + $0x70] sm:$0xff]  ;;  %v304_v42 = vld [vmem:[%s1995_s1 + $0x78] sm:$0xff] }
  0x15   :  { %1181 = vmatprep.subr.bf16.mxu0 %v1402_v2 }
  0x16   :  { %1200 = vmatpush3.bf16.msra.mxu1 %v1404_v11 }
  0x17   :  { %1201 = vmatprep.subr.bf16.mxu1 %v1404_v11 }
  0x18   :  { %1182 = vmatpush3.bf16.msra.mxu0 %v1079_v22 }
  0x19   :  { %1183 = vmatprep.subr.bf16.mxu0 %v1402_v2 }
  0x1a   :  { %1202 = vmatpush3.bf16.msra.mxu1 %v1404_v11 }
  0x1b   :  { %1203 = vmatprep.subr.bf16.mxu1 %v1404_v11 }
  0x1c   :  { %1184 = vmatpush3.bf16.msra.mxu0 %v1078_v25 }
  0x1d   :  { %1185 = vmatprep.subr.bf16.mxu0 %v1402_v2 }
  0x1e   :  { %1204 = vmatpush3.bf16.msra.mxu1 %v1404_v11 }
  0x1f   :  { %1205 = vmatprep.subr.bf16.mxu1 %v1404_v11 }
  0x20   :  { %1186 = vmatpush3.bf16.msra.mxu0 %v1077_v13 }
  0x21   :  { %1223 = vmatprep.subr.mxu0 %v305_v26 }
  0x22   :  { %1206 = vmatpush3.bf16.msra.mxu1 %v1404_v11 }
  0x23   :  { %1188 = vmatmul.mubr.bf16.vlgmr.msra.gmra.mxu0 %v1404_v11 }
  0x24   :  { %1224 = vmatpush3.msra.mxu0 %v305_v26  ;;  %1225 = vmatprep.mubr.msk.f32.mxu0 %vm306_vm1, %v289_v27 }
  0x25   :  { %1208 = vmatmul.mubr.bf16.vlgmr.msra.gmra.mxu1 %v1078_v25 }
  0x26   :  { %1211 = vmatprep.mubr.bf16.mxu1 %v1079_v22 }
  0x2b   :  { %1226 = vmatmul.mubr.msk.f32.vlgmr.msra.gmra.mxu0 %vm306_vm1, %v290_v28 }
  0x2c   :  { %1228 = vmatprep.mubr.msk.f32.mxu0 %vm306_vm1, %v291_v29 }
  0x2d   :  { %1212 = vmatmul.mubr.bf16.gmra.mxu1 %v1080_v19 }
  0x2e   :  { %1215 = vmatprep.mubr.bf16.mxu1 %v1081_v16  ;;  %v267_v16 = vsub.s32 0, %v266_v61 }
  0x2f   :  { %1229 = vmatmul.mubr.msk.f32.gmra.mxu0 %vm306_vm1, %v292_v30 }
  0x30   :  { %1231 = vmatprep.mubr.msk.f32.mxu0 %vm306_vm1, %v293_v31 }
  0x33   :  { %1232 = vmatmul.mubr.msk.f32.gmra.mxu0 %vm306_vm1, %v294_v32 }
  0x34   :  { %1234 = vmatprep.mubr.msk.f32.mxu0 %vm306_vm1, %v295_v33 }
  0x35   :  { %1216 = vmatmul.mubr.bf16.gmra.mxu1 %v1496_v12 }
  0x36   :  { %1219 = vmatprep.mubr.bf16.mxu1 %v1471_v6 }
  0x37   :  { %1235 = vmatmul.mubr.msk.f32.gmra.mxu0 %vm306_vm1, %v296_v34 }
  0x38   :  { %1237 = vmatprep.mubr.msk.f32.mxu0 %vm306_vm1, %v297_v35 }
  0x3b   :  { %1238 = vmatmul.mubr.msk.f32.gmra.mxu0 %vm306_vm1, %v298_v36 }
  0x3c   :  { %1240 = vmatprep.mubr.msk.f32.mxu0 %vm306_vm1, %v299_v37 }
  0x3d   :  { %1220 = vmatmul.mubr.bf16.gmra.mxu1 %v1456_v3 }
  0x3f   :  { %1241 = vmatmul.mubr.msk.f32.gmra.mxu0 %vm306_vm1, %v300_v38 }
  0x40   :  { %1243 = vmatprep.mubr.msk.f32.mxu0 %vm306_vm1, %v301_v39 }
  0x43   :  { %1244 = vmatmul.mubr.msk.f32.gmra.mxu0 %vm306_vm1, %v302_v40 }
  0x44   :  { %1246 = vmatprep.mubr.msk.f32.mxu0 %vm306_vm1, %v303_v41 }
  0x47   :  { %1247 = vmatmul.mubr.msk.f32.gmra.mxu0 %vm306_vm1, %v304_v42 }
  0xe3   :  { %v124_v44 = vpop.f32.mrf.mxu0 }
  0xe4   :  { %v227_v45 = vmax.f32 %v124_v44, 1.0 }
  0xe5   :  { %v1189_v46 = vpop.f32.mrf.mxu0  ;;  %v1209_v48 = vpop.f32.mrf.mxu1 }
  0xe6   :  { %1314 = vrsqrt.f32 %v227_v45  ;;  %v232_v50 = vmax.f32 %v1209_v48, 1.0 }
  0xe7   :  { %v127_v47 = vpop.f32.mrf.mxu0  ;;  %v164_v51 = vpop.f32.mrf.mxu1 }
  0xe8   :  { %1316 = vrsqrt.f32 %v232_v50  ;;  %v230_v53 = vmax.f32 %v164_v51, 1.0 }
  0xe9   :  { %v1190_v49 = vpop.f32.mrf.mxu0  ;;  %v1210_v55 = vpop.f32.mrf.mxu1 }
  0xea   :  { %1318 = vrsqrt.f32 %v230_v53  ;;  %v233_v57 = vmax.f32 %v1210_v55, 1.0 }
  0xeb   :  { %v1619_v52 = vpop.f32.mrf.mxu0  ;;  %v167_v58 = vpop.f32.mrf.mxu1 }
  0xec   :  { %1320 = vrsqrt.f32 %v233_v57  ;;  %v231_v60 = vmax.f32 %v167_v58, 1.0 }
  0xed   :  { %v1621_v56 = vpop.f32.mrf.mxu0  ;;  %v1213_v62 = vpop.f32.mrf.mxu1 }
  0xee   :  { %1322 = vrsqrt.f32 %v231_v60  ;;  %v236_v2 = vmax.f32 %v1213_v62, 1.0 }
  0xef   :  { %v1623_v59 = vpop.f32.mrf.mxu0  ;;  %v180_v3 = vpop.f32.mrf.mxu1 }
  0xf0   :  { %1324 = vrsqrt.f32 %v236_v2  ;;  %v234_v12 = vmax.f32 %v180_v3, 1.0 }
  0xf1   :  { %v1626_v63 = vpop.f32.mrf.mxu0  ;;  %v1214_v19 = vpop.f32.mrf.mxu1 }
  0xf2   :  { %v237_v25 = vmax.f32 %v1214_v19, 1.0  ;;  %1326 = vrsqrt.f32 %v234_v12 }
  0xf3   :  { %v1315_v6 = vpop.eup %1314  ;;  %v1628_v11 = vpop.f32.mrf.mxu0 }
  0xf4   :  { %v229_v13 = vpack.c.bf16 %v1315_v6, %v1315_v6  ;;  %v183_v27 = vpop.f32.mrf.mxu1  ;;  %1328 = vrsqrt.f32 %v237_v25 }
  0xf5   :  { %v1630_v22 = vpop.f32.mrf.mxu0  ;;  %v235_v29 = vmax.f32 %v183_v27, 1.0  ;;  %v1317_v30 = vpop.eup %1316 }
  0xf6   :  { %v263_v26 = vpack.i.b16 %v229_v13, %v229_v13  ;;  %v1217_v32 = vpop.f32.mrf.mxu1  ;;  %671 = vperm.xlu1 %1304, %v1317_v30  }
  0xf7   :  { %v1632_v28 = vpop.f32.mrf.mxu0  ;;  %1330 = vrsqrt.f32 %v235_v29  ;;  %v240_v34 = vmax.f32 %v1217_v32, 1.0  ;;  %v1319_v35 = vpop.eup %1318 }
  0xf8   :  { %v268_v31 = vrot.slane %v263_v26, %v267_v16  ;;  %v196_v37 = vpop.f32.mrf.mxu1  ;;  %661 = vperm.xlu0 %1305, %v1319_v35  }
  0xf9   :  { %v1634_v33 = vpop.f32.mrf.mxu0  ;;  %1332 = vrsqrt.f32 %v240_v34  ;;  %v238_v39 = vmax.f32 %v196_v37, 1.0  ;;  %v1321_v40 = vpop.eup %1320 }
  0xfa   :  { %v1636_v36 = vcombine.low %v268_v31, %v268_v31  ;;  %v1218_v45 = vpop.f32.mrf.mxu1  ;;  %676 = vperm.xlu1 %1304, %v1321_v40  }
  0xfb   :  { %v1638_v38 = vpop.f32.mrf.mxu0  ;;  %v1323_v47 = vpop.eup %1322  ;;  %1334 = vrsqrt.f32 %v238_v39 }
  0xfc   :  { %v273_v41 = vmul.bf16 %v1636_v36, %v1486_v9  ;;  %v274_v42 = vmul.bf16 %v1636_v36, %v1491_v10  ;;  %v277_v43 = vmul.bf16 %v1636_v36, %v1528_v20  ;;  %v278_v44 = vmul.bf16 %v1636_v36, %v1533_v21  ;;  %v199_v50 = vpop.f32.mrf.mxu1  ;;  %666 = vperm.xlu0 %1305, %v1323_v47  }
  0xfd   :  { %v1648_v46 = vpop.f32.mrf.mxu0  ;;  %v1325_v9 = vpop.eup %1324  ;;  %v241_v20 = vmax.f32 %v1218_v45, 1.0  ;;  %v239_v55 = vmax.f32 %v199_v50, 1.0  ;;  %v288_v47 = vmul.bf16 %v1636_v36, %v1452_v1 }
  0xfe   :  { %v1102_v48 = vcombine.low %v273_v41, %v274_v42  ;;  %v1104_v49 = vcombine.low %v277_v43, %v278_v44  ;;  %v1221_v10 = vpop.f32.mrf.mxu1  ;;  %v504_v39 = vpack.c.bf16 %v1638_v38, %v1648_v46  ;;  %v503_v41 = vpack.c.bf16 %v1632_v28, %v1634_v33 }
  0xff   :  { %v1242_v51 = vpop.f32.mrf.mxu0  ;;  %v1327_v21 = vpop.eup %1326  ;;  %1336 = vrsqrt.f32 %v241_v20  ;;  %v244_v60 = vmax.f32 %v1221_v10, 1.0  ;;  %v502_v43 = vpack.c.bf16 %v1628_v11, %v1630_v22  ;;  %v501_v38 = vpack.c.bf16 %v1623_v59, %v1626_v63 }
 0x100   :  { %1265 = vmatprep.mubr.bf16.mxu0 %v1102_v48  ;;  %1269 = vmatprep.mubr.bf16.mxu1 %v1104_v49  ;;  %v212_v57 = vpop.f32.mrf.mxu1  ;;  %v500_v28 = vpack.c.bf16 %v1619_v52, %v1621_v56  ;;  %v275_v11 = vmul.bf16 %v1636_v36, %v1540_v23  ;;  %v276_v22 = vmul.bf16 %v1636_v36, %v1545_v24 }
 0x101   :  { %v471_v53 = vpop.f32.mrf.mxu0  ;;  %v242_v61 = vmax.f32 %v212_v57, 1.0  ;;  %691 = vperm.xlu0 %1305, %v1325_v9   ;;  %v1329_v62 = vpop.eup %1328  ;;  %1338 = vrsqrt.f32 %v244_v60  ;;  %v279_v59 = vmul.bf16 %v1636_v36, %v1516_v17  ;;  %v280_v63 = vmul.bf16 %v1636_v36, %v1521_v18 }
 0x102   :  { %v1222_v2 = vpop.f32.mrf.mxu1  ;;  %696 = vperm.xlu1 %1304, %v1329_v62   ;;  %1340 = vrsqrt.f32 %v239_v55  ;;  %v505_v32 = vpack.c.bf16 %v1242_v51, %v471_v53  ;;  %v281_v33 = vmul.bf16 %v1636_v36, %v1503_v14  ;;  %v282_v52 = vmul.bf16 %v1636_v36, %v1508_v15 }
 0x103   :  { %v1245_v58 = vpop.f32.mrf.mxu0  ;;  %1342 = vrsqrt.f32 %v242_v61  ;;  %v245_v27 = vmax.f32 %v1222_v2, 1.0  ;;  %v1103_v23 = vcombine.low %v275_v11, %v276_v22  ;;  %v1105_v56 = vcombine.low %v279_v59, %v280_v63 }
 0x104   :  { %v1331_v6 = vpop.eup %1330  ;;  %v215_v12 = vpop.f32.mrf.mxu1  ;;  %v1106_v44 = vcombine.low %v281_v33, %v282_v52  ;;  %v283_v17 = vmul.bf16 %v1636_v36, %v1476_v7  ;;  %v284_v18 = vmul.bf16 %v1636_v36, %v1481_v8  ;;  %v285_v14 = vmul.bf16 %v1636_v36, %v1461_v4 }
 0x105   :  { %v481_v3 = vpop.f32.mrf.mxu0  ;;  %v243_v16 = vmax.f32 %v215_v12, 1.0  ;;  %681 = vperm.xlu0 %1305, %v1327_v21   ;;  %v286_v15 = vmul.bf16 %v1636_v36, %v1466_v5  ;;  %v287_v46 = vmul.bf16 %v1636_v36, %v1447_v0  ;;  %v1685_v5 = vand.u32 127, %v265_v54  ;;  %v1690_v0 = vld [vmem:[%s1997_s3] ss:$0 sm:$0xff] }
 0x106   :  { %v1333_v19 = vpop.eup %1332  ;;  %686 = vperm.xlu1 %1304, %v1331_v6   ;;  %v506_v29 = vpack.c.bf16 %v1245_v58, %v481_v3  ;;  %v1107_v24 = vcombine.low %v283_v17, %v284_v18 }
 0x107   :  { %v1248_v13 = vpop.f32.mrf.mxu0  ;;  %1344 = vrsqrt.f32 %v243_v16  ;;  %v1108_v45 = vcombine.low %v285_v14, %v286_v15  ;;  %v1109_v7 = vcombine.low %v287_v46, %v288_v47  ;;  %vm658_vm2 = vcmp.lt.s32.totalorder %v1685_v5, 32 }
 0x108   :  { %v1335_v30 = vpop.eup %1334  ;;  %1346 = vrsqrt.f32 %v245_v27 }
 0x109   :  { %v491_v25 = vpop.f32.mrf.mxu0  ;;  %711 = vperm.xlu0 %1305, %v1333_v19  }
 0x10a   :  { %v507_v26 = vpack.c.bf16 %v1248_v13, %v491_v25 }
 0x10c   :  { %1249 = vmatprep.subr.bf16.mxu0 %v507_v26  ;;  %1281 = vmatprep.subr.bf16.mxu1 %v507_v26  ;;  %v1337_v31 = vpop.eup %1336 }
 0x10d   :  { %1250 = vmatpush3.bf16.msra.mxu0 %v507_v26  ;;  %1289 = vmatpush3.bf16.msra.mxu1 %v507_v26 }
 0x10e   :  { %1251 = vmatprep.subr.bf16.mxu0 %v506_v29  ;;  %1282 = vmatprep.subr.bf16.mxu1 %v506_v29  ;;  %v1339_v34 = vpop.eup %1338 }
 0x10f   :  { %701 = vperm.xlu0 %1305, %v1335_v30   ;;  %v1341_v35 = vpop.eup %1340  ;;  %716 = vperm.xlu1 %1304, %v1337_v31  }
 0x110   :  { %v1343_v37 = vpop.eup %1342 }
 0x111   :  { %1252 = vmatpush3.bf16.msra.mxu0 %v506_v29  ;;  %1290 = vmatpush3.bf16.msra.mxu1 %v506_v29 }
 0x112   :  { %1253 = vmatprep.subr.bf16.mxu0 %v505_v32  ;;  %1283 = vmatprep.subr.bf16.mxu1 %v505_v32 }
 0x113   :  { %731 = vperm.xlu0 %1305, %v1339_v34   ;;  %706 = vperm.xlu1 %1304, %v1341_v35  }
 0x114   :  { %v1345_v40 = vpop.eup %1344 }
 0x115   :  { %1254 = vmatpush3.bf16.msra.mxu0 %v505_v32  ;;  %1291 = vmatpush3.bf16.msra.mxu1 %v505_v32  ;;  %v1347_v42 = vpop.eup %1346 }
 0x116   :  { %1255 = vmatprep.subr.bf16.mxu0 %v504_v39  ;;  %1284 = vmatprep.subr.bf16.mxu1 %v504_v39 }
 0x117   :  { %721 = vperm.xlu0 %1305, %v1343_v37   ;;  %726 = vperm.xlu1 %1304, %v1345_v40  }
 0x119   :  { %1256 = vmatpush3.bf16.msra.mxu0 %v504_v39  ;;  %1292 = vmatpush3.bf16.msra.mxu1 %v504_v39 }
 0x11a   :  { %1257 = vmatprep.subr.bf16.mxu0 %v503_v41  ;;  %1285 = vmatprep.subr.bf16.mxu1 %v503_v41 }
 0x11b   :  { %736 = vperm.xlu1 %1304, %v1347_v42  }
 0x11d   :  { %1258 = vmatpush3.bf16.msra.mxu0 %v503_v41  ;;  %1293 = vmatpush3.bf16.msra.mxu1 %v503_v41 }
 0x11e   :  { %1259 = vmatprep.subr.bf16.mxu0 %v502_v43  ;;  %1286 = vmatprep.subr.bf16.mxu1 %v502_v43 }
 0x121   :  { %1260 = vmatpush3.bf16.msra.mxu0 %v502_v43  ;;  %1294 = vmatpush3.bf16.msra.mxu1 %v502_v43 }
 0x122   :  { %1261 = vmatprep.subr.bf16.mxu0 %v501_v38  ;;  %1287 = vmatprep.subr.bf16.mxu1 %v501_v38 }
 0x125   :  { %1262 = vmatpush3.bf16.msra.mxu0 %v501_v38  ;;  %1295 = vmatpush3.bf16.msra.mxu1 %v501_v38 }
 0x126   :  { %1263 = vmatprep.subr.bf16.mxu0 %v500_v28  ;;  %1288 = vmatprep.subr.bf16.mxu1 %v500_v28 }
 0x129   :  { %1264 = vmatpush3.bf16.msra.mxu0 %v500_v28  ;;  %1296 = vmatpush3.bf16.msra.mxu1 %v500_v28 }
 0x12c   :  { %1266 = vmatmul.mubr.bf16.vlgmr.msra.gmra.mxu0 %v1103_v23  ;;  %1270 = vmatmul.mubr.bf16.vlgmr.msra.gmra.mxu1 %v1105_v56 }
 0x12d   :  { %1273 = vmatprep.mubr.bf16.mxu1 %v1106_v44 }
 0x134   :  { %1274 = vmatmul.mubr.bf16.gmra.mxu1 %v1107_v24 }
 0x135   :  { %1277 = vmatprep.mubr.bf16.mxu1 %v1108_v45 }
 0x13c   :  { %1278 = vmatmul.mubr.bf16.gmra.mxu1 %v1109_v7 }
 0x171   :  { %v672_v49 = vpop.permute.xlu1 %671 }
 0x173   :  { %v662_v48 = vpop.permute.xlu0 %661 }
 0x175   :  { %v677_v4 = vpop.permute.xlu1 %676 }
 0x177   :  { %v667_v8 = vpop.permute.xlu0 %666 }
 0x17c   :  { %v692_v50 = vpop.permute.xlu0 %691 }
 0x17d   :  { %v697_v9 = vpop.permute.xlu1 %696 }
 0x180   :  { %v682_v51 = vpop.permute.xlu0 %681 }
 0x181   :  { %v687_v21 = vpop.permute.xlu1 %686 }
 0x184   :  { %v712_v10 = vpop.permute.xlu0 %711 }
 0x18a   :  { %v702_v3 = vpop.permute.xlu0 %701  ;;  %v717_v39 = vpop.permute.xlu1 %716 }
 0x18e   :  { %v732_v41 = vpop.permute.xlu0 %731  ;;  %v707_v33 = vpop.permute.xlu1 %706 }
 0x192   :  { %v722_v14 = vpop.permute.xlu0 %721 }
 0x1ec   :  { %v1267_v53 = vpop.f32.mrf.mxu0  ;;  %v1271_v20 = vpop.f32.mrf.mxu1 }
 0x1ed   :  { %v741_v1 = vmul.f32 %v1267_v53, %v672_v49  ;;  %v745_v36 = vmul.f32 %v1271_v20, %v692_v50  ;;  %v727_v50 = vpop.permute.xlu1 %726 }
 0x1ee   :  { %v590_v55 = vpop.f32.mrf.mxu0  ;;  %v606_v57 = vpop.f32.mrf.mxu1 }
 0x1ef   :  { %v739_v58 = vmul.f32 %v662_v48, %v590_v55  ;;  %v743_v60 = vmul.f32 %v682_v51, %v606_v57  ;;  %v767_v54 = vadd.f32 %v1690_v0, %v745_v36  ;;  %v763_v61 = vadd.f32 %v1690_v0, %v741_v1 }
 0x1f0   :  { %v1268_v62 = vpop.f32.mrf.mxu0  ;;  %v1272_v2 = vpop.f32.mrf.mxu1 }
 0x1f1   :  { %v742_v6 = vmul.f32 %v1268_v62, %v677_v4  ;;  %v1697_v12 = vsel %vm658_vm2, %v767_v54, 0.0  ;;  %v1701_v13 = vsel %vm658_vm2, %v763_v61, 0.0  ;;  %v765_v25 = vadd.f32 %v1690_v0, %v743_v60  ;;  %v737_v1 = vpop.permute.xlu1 %736 }
 0x1f2   :  { %805 = vadd.xlane.f32.xlu1 %v1697_v12  ;;  %v609_v16 = vpop.f32.mrf.mxu1  ;;  %797 = vadd.xlane.f32.xlu0 %v1701_v13  ;;  %v593_v19 = vpop.f32.mrf.mxu0  ;;  %v761_v26 = vadd.f32 %v1690_v0, %v739_v58  ;;  %v746_v29 = vmul.f32 %v1272_v2, %v697_v9 }
 0x1f3   :  { %v740_v27 = vmul.f32 %v667_v8, %v593_v19  ;;  %v764_v31 = vadd.f32 %v1690_v0, %v742_v6  ;;  %v1710_v34 = vsel %vm658_vm2, %v765_v25, 0.0  ;;  %v744_v42 = vmul.f32 %v687_v21, %v609_v16 }
 0x1f4   :  { %v1275_v30 = vpop.f32.mrf.mxu1  ;;  %v1714_v35 = vsel %vm658_vm2, %v761_v26, 0.0  ;;  %v768_v38 = vadd.f32 %v1690_v0, %v746_v29 }
 0x1f5   :  { %v749_v32 = vmul.f32 %v1275_v30, %v712_v10  ;;  %v762_v37 = vadd.f32 %v1690_v0, %v740_v27  ;;  %v1722_v11 = vsel %vm658_vm2, %v764_v31, 0.0  ;;  %v766_v56 = vadd.f32 %v1690_v0, %v744_v42 }
 0x1f6   :  { %801 = vadd.xlane.f32.xlu1 %v1710_v34  ;;  %v622_v40 = vpop.f32.mrf.mxu1  ;;  %793 = vadd.xlane.f32.xlu0 %v1714_v35  ;;  %v1734_v44 = vsel %vm658_vm2, %v768_v38, 0.0 }
 0x1f7   :  { %v747_v28 = vmul.f32 %v702_v3, %v622_v40  ;;  %v1726_v22 = vsel %vm658_vm2, %v762_v37, 0.0  ;;  %v771_v59 = vadd.f32 %v1690_v0, %v749_v32  ;;  %v1745_v46 = vsel %vm658_vm2, %v766_v56, 0.0 }
 0x1f8   :  { %v1276_v43 = vpop.f32.mrf.mxu1 }
 0x1f9   :  { %v750_v52 = vmul.f32 %v1276_v43, %v717_v39  ;;  %v1738_v17 = vsel %vm658_vm2, %v771_v59, 0.0  ;;  %v769_v18 = vadd.f32 %v1690_v0, %v747_v28 }
 0x1fa   :  { %v625_v63 = vpop.f32.mrf.mxu1  ;;  %799 = vadd.xlane.f32.xlu0 %v1722_v11  ;;  %795 = vadd.xlane.f32.xlu1 %v1726_v22 }
 0x1fb   :  { %v772_v47 = vadd.f32 %v1690_v0, %v750_v52  ;;  %v748_v7 = vmul.f32 %v707_v33, %v625_v63  ;;  %v1750_v8 = vsel %vm658_vm2, %v769_v18, 0.0 }
 0x1fc   :  { %v1279_v23 = vpop.f32.mrf.mxu1 }
 0x1fd   :  { %v753_v48 = vmul.f32 %v1279_v23, %v732_v41  ;;  %v1757_v51 = vsel %vm658_vm2, %v772_v47, 0.0  ;;  %v770_v53 = vadd.f32 %v1690_v0, %v748_v7 }
 0x1fe   :  { %v638_v15 = vpop.f32.mrf.mxu1  ;;  %807 = vadd.xlane.f32.xlu0 %v1734_v44  ;;  %813 = vadd.xlane.f32.xlu1 %v1738_v17 }
 0x1ff   :  { %v751_v24 = vmul.f32 %v722_v14, %v638_v15  ;;  %v775_v20 = vadd.f32 %v1690_v0, %v753_v48  ;;  %v1769_v55 = vsel %vm658_vm2, %v770_v53, 0.0 }
 0x200   :  { %v1280_v45 = vpop.f32.mrf.mxu1 }
 0x201   :  { %v773_v49 = vadd.f32 %v1690_v0, %v751_v24  ;;  %v754_v36 = vmul.f32 %v1280_v45, %v737_v1  ;;  %v1773_v57 = vsel %vm658_vm2, %v775_v20, 0.0 }
 0x202   :  { %v641_v4 = vpop.f32.mrf.mxu1  ;;  %803 = vadd.xlane.f32.xlu0 %v1745_v46  ;;  %809 = vadd.xlane.f32.xlu1 %v1750_v8 }
 0x203   :  { %v752_v9 = vmul.f32 %v727_v50, %v641_v4  ;;  %v1761_v10 = vsel %vm658_vm2, %v773_v49, 0.0  ;;  %v776_v60 = vadd.f32 %v1690_v0, %v754_v36 }
 0x205   :  { %v774_v21 = vadd.f32 %v1690_v0, %v752_v9  ;;  %v1786_v54 = vsel %vm658_vm2, %v776_v60, 0.0 }
 0x206   :  { %815 = vadd.xlane.f32.xlu0 %v1757_v51  ;;  %817 = vadd.xlane.f32.xlu1 %v1761_v10 }
 0x207   :  { %v1780_v58 = vsel %vm658_vm2, %v774_v21, 0.0 }
 0x20a   :  { %811 = vadd.xlane.f32.xlu0 %v1769_v55  ;;  %821 = vadd.xlane.f32.xlu1 %v1773_v57 }
 0x20e   :  { %819 = vadd.xlane.f32.xlu0 %v1780_v58 }
 0x212   :  { %823 = vadd.xlane.f32.xlu0 %v1786_v54 }
 0x27b   :  { %v806_v61 = vpop.xlane.xlu1 %805  ;;  %v798_v62 = vpop.xlane.xlu0 %797 }
 0x27c   :  { %v831_v2 = vmul.f32 0.03125, %v806_v61  ;;  %v827_v3 = vmul.f32 0.03125, %v798_v62 }
 0x27e   :  { %v847_v6 = vsub.f32 %v1697_v12, %v831_v2  ;;  %v843_v16 = vsub.f32 %v1701_v13, %v827_v3 }
 0x27f   :  { %v802_v19 = vpop.xlane.xlu1 %801  ;;  %v794_v25 = vpop.xlane.xlu0 %793 }
 0x280   :  { %v825_v26 = vmul.f32 0.03125, %v794_v25  ;;  %v1793_v0 = vsel %vm658_vm2, %v843_v16, 0.0  ;;  %v829_v29 = vmul.f32 0.03125, %v802_v19  ;;  %v1800_v31 = vsel %vm658_vm2, %v847_v6, 0.0 }
 0x281   :  { %v875_v27 = vmul.f32 %v1793_v0, %v1793_v0  ;;  %v879_v37 = vmul.f32 %v1800_v31, %v1800_v31 }
 0x282   :  { %v841_v30 = vsub.f32 %v1714_v35, %v825_v26  ;;  %v845_v39 = vsub.f32 %v1710_v34, %v829_v29 }
 0x283   :  { %v800_v12 = vpop.xlane.xlu0 %799  ;;  %893 = vadd.xlane.f32.xlu1 %v875_v27  ;;  %v796_v13 = vpop.xlane.xlu1 %795 }
 0x284   :  { %v828_v32 = vmul.f32 0.03125, %v800_v12  ;;  %v826_v41 = vmul.f32 0.03125, %v796_v13  ;;  %v1808_v42 = vsel %vm658_vm2, %v841_v30, 0.0  ;;  %v1823_v23 = vsel %vm658_vm2, %v845_v39, 0.0 }
 0x285   :  { %v873_v34 = vmul.f32 %v1808_v42, %v1808_v42 }
 0x286   :  { %v844_v40 = vsub.f32 %v1722_v11, %v828_v32  ;;  %v842_v11 = vsub.f32 %v1726_v22, %v826_v41 }
 0x287   :  { %v808_v35 = vpop.xlane.xlu0 %807  ;;  %901 = vadd.xlane.f32.xlu1 %v879_v37  ;;  %v814_v43 = vpop.xlane.xlu1 %813 }
 0x288   :  { %v832_v38 = vmul.f32 0.03125, %v808_v35  ;;  %v835_v28 = vmul.f32 0.03125, %v814_v43  ;;  %v1812_v59 = vsel %vm658_vm2, %v844_v40, 0.0  ;;  %v1837_v47 = vsel %vm658_vm2, %v842_v11, 0.0 }
 0x289   :  { %v876_v63 = vmul.f32 %v1812_v59, %v1812_v59  ;;  %v874_v9 = vmul.f32 %v1837_v47, %v1837_v47 }
 0x28a   :  { %v848_v33 = vsub.f32 %v1734_v44, %v832_v38  ;;  %v851_v52 = vsub.f32 %v1738_v17, %v835_v28  ;;  %v877_v44 = vmul.f32 %v1823_v23, %v1823_v23 }
 0x28b   :  { %895 = vadd.xlane.f32.xlu0 %v876_v63  ;;  %v804_v56 = vpop.xlane.xlu0 %803  ;;  %889 = vadd.xlane.f32.xlu1 %v873_v34  ;;  %v810_v18 = vpop.xlane.xlu1 %809 }
 0x28c   :  { %v830_v14 = vmul.f32 0.03125, %v804_v56  ;;  %v833_v15 = vmul.f32 0.03125, %v810_v18  ;;  %v1827_v24 = vsel %vm658_vm2, %v848_v33, 0.0  ;;  %v1841_v7 = vsel %vm658_vm2, %v851_v52, 0.0 }
 0x28d   :  { %v880_v22 = vmul.f32 %v1827_v24, %v1827_v24 }
 0x28e   :  { %v846_v17 = vsub.f32 %v1745_v46, %v830_v14  ;;  %v849_v45 = vsub.f32 %v1750_v8, %v833_v15  ;;  %v883_v46 = vmul.f32 %v1841_v7, %v1841_v7 }
 0x28f   :  { %903 = vadd.xlane.f32.xlu0 %v880_v22  ;;  %v816_v48 = vpop.xlane.xlu0 %815  ;;  %897 = vadd.xlane.f32.xlu1 %v877_v44  ;;  %v818_v49 = vpop.xlane.xlu1 %817 }
 0x290   :  { %v836_v50 = vmul.f32 0.03125, %v816_v48  ;;  %v837_v4 = vmul.f32 0.03125, %v818_v49  ;;  %v1851_v20 = vsel %vm658_vm2, %v846_v17, 0.0  ;;  %v1855_v1 = vsel %vm658_vm2, %v849_v45, 0.0 }
 0x291   :  { %v878_v62 = vmul.f32 %v1851_v20, %v1851_v20 }
 0x292   :  { %v852_v8 = vsub.f32 %v1757_v51, %v836_v50  ;;  %v853_v53 = vsub.f32 %v1761_v10, %v837_v4  ;;  %v881_v51 = vmul.f32 %v1855_v1, %v1855_v1 }
 0x293   :  { %v812_v36 = vpop.xlane.xlu0 %811  ;;  %891 = vadd.xlane.f32.xlu0 %v874_v9  ;;  %909 = vadd.xlane.f32.xlu1 %v883_v46  ;;  %v822_v21 = vpop.xlane.xlu1 %821  ;;  %v1904_v9 = vld [vmem:[%s1998_s4] ss:$0 sm:$0xff]  ;;  %s1406_s4 = smov [#allocation2]  }
 0x294   :  { %v834_v60 = vmul.f32 0.03125, %v812_v36  ;;  %v839_v61 = vmul.f32 0.03125, %v822_v21  ;;  %v1865_v3 = vsel %vm658_vm2, %v852_v8, 0.0  ;;  %v1869_v6 = vsel %vm658_vm2, %v853_v53, 0.0  ;;  %v1910_v36 = vld [vmem:[%s1999_s5] ss:$0 sm:$0xff] }
 0x295   :  { %v884_v25 = vmul.f32 %v1865_v3, %v1865_v3  ;;  %s1066_s5 = sshll.u32 %s1406_s4, 4  ;;  %s1067_s5 = int_to_ptr.vmem [resolvable:$true] %s1066_s5 }
 0x296   :  { %v850_v10 = vsub.f32 %v1769_v55, %v834_v60  ;;  %v855_v2 = vsub.f32 %v1773_v57, %v839_v61  ;;  %v885_v55 = vmul.f32 %v1869_v6, %v1869_v6  ;;  %s1380_s15 = scalar_lea.vmem %s1067_s5, 2048  ;;  %p1385_p1 = scmp.lt.s32.totalorder %s1067_s5, %s1067_s5 }
 0x297   :  { %v820_v16 = vpop.xlane.xlu0 %819  ;;  %899 = vadd.xlane.f32.xlu0 %v878_v62  ;;  %905 = vadd.xlane.f32.xlu1 %v881_v51  ;;  %p1381_p0 = scmp.ne.s32.totalorder %s1067_s5, %s1380_s15  ;;  %p1386_p2 = scmp.lt.s32.totalorder %s1380_s15, %s1380_s15 }
 0x298   :  { %v838_v19 = vmul.f32 0.03125, %v820_v16  ;;  %v1878_v26 = vsel %vm658_vm2, %v850_v10, 0.0  ;;  %v1882_v27 = vsel %vm658_vm2, %v855_v2, 0.0 }
 0x299   :  { %v882_v12 = vmul.f32 %v1878_v26, %v1878_v26  ;;  %v887_v13 = vmul.f32 %v1882_v27, %v1882_v27  ;;  %p1387_p3 = por %p1386_p2, %p1385_p1 }
 0x29a   :  { %v854_v57 = vsub.f32 %v1780_v58, %v838_v19 }
 0x29b   :  { %v824_v29 = vpop.xlane.xlu0 %823  ;;  %911 = vadd.xlane.f32.xlu0 %v884_v25  ;;  %913 = vadd.xlane.f32.xlu1 %v885_v55  ;;  %p1388_p4 = pnand %p1387_p3, %p1381_p0 }
 0x29c   :  { %v840_v30 = vmul.f32 0.03125, %v824_v29  ;;  %v1891_v32 = vsel %vm658_vm2, %v854_v57, 0.0 }
 0x29d   :  { %v886_v37 = vmul.f32 %v1891_v32, %v1891_v32 }
 0x29e   :  { %v856_v58 = vsub.f32 %v1786_v54, %v840_v30 }
 0x29f   :  { %907 = vadd.xlane.f32.xlu0 %v882_v12  ;;  %917 = vadd.xlane.f32.xlu1 %v887_v13 }
 0x2a0   :  { %v1897_v39 = vsel %vm658_vm2, %v856_v58, 0.0 }
 0x2a1   :  { %v888_v40 = vmul.f32 %v1897_v39, %v1897_v39 }
 0x2a3   :  { %915 = vadd.xlane.f32.xlu0 %v886_v37 }
 0x2a7   :  { %919 = vadd.xlane.f32.xlu0 %v888_v40 }
 0x30c   :  { %v894_v41 = vpop.xlane.xlu1 %893 }
 0x30d   :  { %v923_v54 = vmul.f32 0.03125, %v894_v41 }
 0x30f   :  { %v939_v35 = vadd.f32 1e-05, %v923_v54 }
 0x310   :  { %v902_v43 = vpop.xlane.xlu1 %901 }
 0x311   :  { %1348 = vrsqrt.f32 %v939_v35  ;;  %v927_v38 = vmul.f32 0.03125, %v902_v43 }
 0x313   :  { %v943_v28 = vadd.f32 1e-05, %v927_v38 }
 0x314   :  { %v896_v63 = vpop.xlane.xlu0 %895  ;;  %v890_v34 = vpop.xlane.xlu1 %889 }
 0x315   :  { %1350 = vrsqrt.f32 %v943_v28  ;;  %v924_v11 = vmul.f32 0.03125, %v896_v63  ;;  %v921_v33 = vmul.f32 0.03125, %v890_v34 }
 0x317   :  { %v940_v52 = vadd.f32 1e-05, %v924_v11  ;;  %v937_v56 = vadd.f32 1e-05, %v921_v33 }
 0x318   :  { %v904_v18 = vpop.xlane.xlu0 %903  ;;  %v898_v14 = vpop.xlane.xlu1 %897 }
 0x319   :  { %1352 = vrsqrt.f32 %v940_v52  ;;  %v928_v15 = vmul.f32 0.03125, %v904_v18  ;;  %v925_v22 = vmul.f32 0.03125, %v898_v14 }
 0x31a   :  { %1354 = vrsqrt.f32 %v937_v56 }
 0x31b   :  { %v944_v44 = vadd.f32 1e-05, %v928_v15  ;;  %v941_v17 = vadd.f32 1e-05, %v925_v22 }
 0x31c   :  { %v892_v45 = vpop.xlane.xlu0 %891  ;;  %v910_v48 = vpop.xlane.xlu1 %909 }
 0x31d   :  { %1356 = vrsqrt.f32 %v944_v44  ;;  %v922_v49 = vmul.f32 0.03125, %v892_v45  ;;  %v931_v50 = vmul.f32 0.03125, %v910_v48 }
 0x31e   :  { %v1349_v4 = vpop.eup %1348  ;;  %1358 = vrsqrt.f32 %v941_v17 }
 0x31f   :  { %v971_v46 = vmul.f32 %v1349_v4, %v1793_v0  ;;  %v938_v8 = vadd.f32 1e-05, %v922_v49  ;;  %v947_v53 = vadd.f32 1e-05, %v931_v50 }
 0x320   :  { %v900_v21 = vpop.xlane.xlu0 %899  ;;  %v906_v60 = vpop.xlane.xlu1 %905 }
 0x321   :  { %v993_v61 = vmul.f32 %v1904_v9, %v971_v46  ;;  %1360 = vrsqrt.f32 %v938_v8  ;;  %v926_v62 = vmul.f32 0.03125, %v900_v21  ;;  %v929_v51 = vmul.f32 0.03125, %v906_v60 }
 0x322   :  { %v1351_v10 = vpop.eup %1350  ;;  %1362 = vrsqrt.f32 %v947_v53 }
 0x323   :  { %v1015_v2 = vadd.f32 %v1910_v36, %v993_v61  ;;  %v975_v0 = vmul.f32 %v1351_v10, %v1800_v31  ;;  %v942_v16 = vadd.f32 1e-05, %v926_v62  ;;  %v945_v19 = vadd.f32 1e-05, %v929_v51 }
 0x324   :  { %v912_v25 = vpop.xlane.xlu0 %911  ;;  %v914_v55 = vpop.xlane.xlu1 %913 }
 0x325   :  { %v1031_v57 = vsel %vm658_vm2, %v1015_v2, 0.0  ;;  %v997_v29 = vmul.f32 %v1904_v9, %v975_v0  ;;  %1364 = vrsqrt.f32 %v942_v16  ;;  %v932_v30 = vmul.f32 0.03125, %v912_v25 }
 0x326   :  { %v1353_v12 = vpop.eup %1352  ;;  %1047 = vst [vmem:[#allocation2 + $0x10] sm:$0xff] %v1031_v57  ;;  %1366 = vrsqrt.f32 %v945_v19  ;;  %v933_v13 = vmul.f32 0.03125, %v914_v55 }
 0x327   :  { %v1355_v58 = vpop.eup %1354  ;;  %v1019_v37 = vadd.f32 %v1910_v36, %v997_v29  ;;  %v972_v31 = vmul.f32 %v1353_v12, %v1812_v59  ;;  %v948_v40 = vadd.f32 1e-05, %v932_v30 }
 0x328   :  { %v969_v41 = vmul.f32 %v1355_v58, %v1808_v42  ;;  %v949_v54 = vadd.f32 1e-05, %v933_v13  ;;  %v908_v35 = vpop.xlane.xlu0 %907  ;;  %v918_v43 = vpop.xlane.xlu1 %917 }
 0x329   :  { %v1035_v38 = vsel %vm658_vm2, %v1019_v37, 0.0  ;;  %v994_v28 = vmul.f32 %v1904_v9, %v972_v31  ;;  %1368 = vrsqrt.f32 %v948_v40  ;;  %v930_v63 = vmul.f32 0.03125, %v908_v35 }
 0x32a   :  { %v1357_v34 = vpop.eup %1356  ;;  %1051 = vst [vmem:[#allocation2 + $0x30] sm:$0xff] %v1035_v38  ;;  %v991_v11 = vmul.f32 %v1904_v9, %v969_v41  ;;  %1370 = vrsqrt.f32 %v949_v54  ;;  %v935_v33 = vmul.f32 0.03125, %v918_v43 }
 0x32b   :  { %v1359_v59 = vpop.eup %1358  ;;  %v1016_v52 = vadd.f32 %v1910_v36, %v994_v28  ;;  %v976_v42 = vmul.f32 %v1357_v34, %v1827_v24  ;;  %v946_v56 = vadd.f32 1e-05, %v930_v63 }
 0x32c   :  { %v1013_v18 = vadd.f32 %v1910_v36, %v991_v11  ;;  %v973_v14 = vmul.f32 %v1359_v59, %v1823_v23  ;;  %v951_v15 = vadd.f32 1e-05, %v935_v33  ;;  %v916_v22 = vpop.xlane.xlu0 %915 }
 0x32d   :  { %v1032_v44 = vsel %vm658_vm2, %v1016_v52, 0.0  ;;  %v998_v17 = vmul.f32 %v1904_v9, %v976_v42  ;;  %1372 = vrsqrt.f32 %v946_v56  ;;  %v934_v45 = vmul.f32 0.03125, %v916_v22 }
 0x32e   :  { %v1361_v48 = vpop.eup %1360  ;;  %1048 = vst [vmem:[#allocation2 + $0x18] sm:$0xff] %v1032_v44  ;;  %v1029_v49 = vsel %vm658_vm2, %v1013_v18, 0.0  ;;  %v995_v24 = vmul.f32 %v1904_v9, %v973_v14  ;;  %1374 = vrsqrt.f32 %v951_v15 }
 0x32f   :  { %v1363_v50 = vpop.eup %1362  ;;  %1045 = vst [vmem:[#allocation2] sm:$0xff] %v1029_v49  ;;  %v1020_v23 = vadd.f32 %v1910_v36, %v998_v17  ;;  %v970_v4 = vmul.f32 %v1361_v48, %v1837_v47  ;;  %v950_v46 = vadd.f32 1e-05, %v934_v45 }
 0x330   :  { %v1017_v8 = vadd.f32 %v1910_v36, %v995_v24  ;;  %v979_v53 = vmul.f32 %v1363_v50, %v1841_v7  ;;  %v920_v21 = vpop.xlane.xlu0 %919 }
 0x331   :  { %v1036_v60 = vsel %vm658_vm2, %v1020_v23, 0.0  ;;  %v992_v61 = vmul.f32 %v1904_v9, %v970_v4  ;;  %1376 = vrsqrt.f32 %v950_v46  ;;  %v936_v62 = vmul.f32 0.03125, %v920_v21 }
 0x332   :  { %v1365_v51 = vpop.eup %1364  ;;  %1052 = vst [vmem:[#allocation2 + $0x38] sm:$0xff] %v1036_v60  ;;  %v1033_v10 = vsel %vm658_vm2, %v1017_v8, 0.0  ;;  %v1001_v47 = vmul.f32 %v1904_v9, %v979_v53 }
 0x333   :  { %v1367_v2 = vpop.eup %1366  ;;  %1049 = vst [vmem:[#allocation2 + $0x20] sm:$0xff] %v1033_v10  ;;  %v1014_v0 = vadd.f32 %v1910_v36, %v992_v61  ;;  %v974_v7 = vmul.f32 %v1365_v51, %v1851_v20  ;;  %v952_v16 = vadd.f32 1e-05, %v936_v62 }
 0x334   :  { %v1023_v19 = vadd.f32 %v1910_v36, %v1001_v47  ;;  %v977_v25 = vmul.f32 %v1367_v2, %v1855_v1 }
 0x335   :  { %v1030_v55 = vsel %vm658_vm2, %v1014_v0, 0.0  ;;  %v996_v57 = vmul.f32 %v1904_v9, %v974_v7  ;;  %1378 = vrsqrt.f32 %v952_v16 }
 0x336   :  { %v1369_v29 = vpop.eup %1368  ;;  %1046 = vst [vmem:[#allocation2 + $0x8] sm:$0xff] %v1030_v55  ;;  %v1039_v30 = vsel %vm658_vm2, %v1023_v19, 0.0  ;;  %v999_v12 = vmul.f32 %v1904_v9, %v977_v25 }
 0x337   :  { %v1371_v13 = vpop.eup %1370  ;;  %1055 = vst [vmem:[#allocation2 + $0x50] sm:$0xff] %v1039_v30  ;;  %v1018_v20 = vadd.f32 %v1910_v36, %v996_v57  ;;  %v980_v58 = vmul.f32 %v1369_v29, %v1865_v3 }
 0x338   :  { %v1021_v1 = vadd.f32 %v1910_v36, %v999_v12  ;;  %v981_v37 = vmul.f32 %v1371_v13, %v1869_v6 }
 0x339   :  { %v1034_v31 = vsel %vm658_vm2, %v1018_v20, 0.0  ;;  %v1002_v40 = vmul.f32 %v1904_v9, %v980_v58 }
 0x33a   :  { %v1373_v41 = vpop.eup %1372  ;;  %1050 = vst [vmem:[#allocation2 + $0x28] sm:$0xff] %v1034_v31  ;;  %v1037_v54 = vsel %vm658_vm2, %v1021_v1, 0.0  ;;  %v1003_v35 = vmul.f32 %v1904_v9, %v981_v37 }
 0x33b   :  { %v1375_v43 = vpop.eup %1374  ;;  %1053 = vst [vmem:[#allocation2 + $0x40] sm:$0xff] %v1037_v54  ;;  %v1024_v3 = vadd.f32 %v1910_v36, %v1002_v40  ;;  %v978_v38 = vmul.f32 %v1373_v41, %v1878_v26 }
 0x33c   :  { %v1025_v6 = vadd.f32 %v1910_v36, %v1003_v35  ;;  %v983_v28 = vmul.f32 %v1375_v43, %v1882_v27 }
 0x33d   :  { %v1040_v63 = vsel %vm658_vm2, %v1024_v3, 0.0  ;;  %v1000_v34 = vmul.f32 %v1904_v9, %v978_v38 }
 0x33e   :  { %v1377_v11 = vpop.eup %1376  ;;  %1056 = vst [vmem:[#allocation2 + $0x58] sm:$0xff] %v1040_v63  ;;  %v1041_v33 = vsel %vm658_vm2, %v1025_v6, 0.0  ;;  %v1005_v59 = vmul.f32 %v1904_v9, %v983_v28 }
 0x33f   :  { %1057 = vst [vmem:[#allocation2 + $0x60] sm:$0xff] %v1041_v33  ;;  %v1022_v52 = vadd.f32 %v1910_v36, %v1000_v34  ;;  %v982_v26 = vmul.f32 %v1377_v11, %v1891_v32 }
 0x340   :  { %v1027_v42 = vadd.f32 %v1910_v36, %v1005_v59 }
 0x341   :  { %v1038_v27 = vsel %vm658_vm2, %v1022_v52, 0.0  ;;  %v1004_v56 = vmul.f32 %v1904_v9, %v982_v26 }
 0x342   :  { %v1379_v18 = vpop.eup %1378  ;;  %1054 = vst [vmem:[#allocation2 + $0x48] sm:$0xff] %v1038_v27  ;;  %v1043_v14 = vsel %vm658_vm2, %v1027_v42, 0.0 }
 0x343   :  { %1059 = vst [vmem:[#allocation2 + $0x70] sm:$0xff] %v1043_v14  ;;  %v1026_v15 = vadd.f32 %v1910_v36, %v1004_v56  ;;  %v984_v22 = vmul.f32 %v1379_v18, %v1897_v39 }
 0x345   :  { %v1042_v32 = vsel %vm658_vm2, %v1026_v15, 0.0  ;;  %v1006_v44 = vmul.f32 %v1904_v9, %v984_v22 }
 0x346   :  { %1058 = vst [vmem:[#allocation2 + $0x68] sm:$0xff] %v1042_v32 }
 0x347   :  { %v1028_v17 = vadd.f32 %v1910_v36, %v1006_v44 }
 0x349   :  { %v1044_v45 = vsel %vm658_vm2, %v1028_v17, 0.0 }
 0x34a   :  { %1060 = vst [vmem:[#allocation2 + $0x78] sm:$0xff] %v1044_v45 }
 0x34b   :  { %1391 = shalt.err (!%p1388_p4)
}
 0x34c   :  { %s1407_s16 = smov 128   ;;  %s1408_s17 = smov 8  }
 0x34d   :  { %1072 = dma.vmem_to_hbm [thread:$0]  %s1067_s5, 2048, %s2000_s6, [#allocation3], %s1407_s16, %s1407_s16, %s1408_s17  }
 0x34e   :  { %1400 = dma.done.wait [#allocation3], 2048  }
 0x34f   :  { %1401 = vsyncadd [#allocation3], 4294965248 }
 0x350   :  { %1076 = vsyncpa [#allocation3], 1 }

</bundles_post_ra>
